<compile_context>
chip_gen: v7x
topology: tpu7x:2x2x1
jax: 0.10.0
libtpu: 0.0.40
codegen_flags: <defaults>
</compile_context>

<pallas_src>
import jax
import jax.numpy as jnp
from jax.experimental import pallas as pl
from jax.experimental.pallas import tpu as pltpu


def _round_up(x: int, m: int) -> int:
    return ((x + m - 1) // m) * m


# ---------------------------------------------------------------------------
# Kernels
# ---------------------------------------------------------------------------

def _small_linear_kernel(x_ref, wt_ref, b_ref, o_ref):
    # Whole arrays live in VMEM as single blocks. One MXU pass + bias add.
    o_ref[...] = (
        jnp.dot(x_ref[...], wt_ref[...], preferred_element_type=jnp.float32)
        + b_ref[...]
    )


def _tiled_linear_kernel(x_ref, wt_ref, b_ref, o_ref):
    # x_ref:  (tm, tk) VMEM
    # wt_ref: (tk, tn) VMEM   (weight pre-transposed to (in, out) at init)
    # b_ref:  (1,  tn) VMEM
    # o_ref:  (tm, tn) VMEM f32 -- block index (i, j) is constant across the
    #         K grid axis, so this tile stays VMEM-resident and doubles as the
    #         accumulator (no scratch, no final astype copy).
    k = pl.program_id(2)

    @pl.when(k == 0)
    def _init():
        # Bias folded into the accumulator init: one broadcast per (i, j) tile.
        o_ref[...] = jnp.broadcast_to(b_ref[...], o_ref.shape)

    o_ref[...] += jnp.dot(x_ref[...], wt_ref[...],
                          preferred_element_type=jnp.float32)


# ---------------------------------------------------------------------------
# Wrapper: one-time param prep + per-call dispatch
# ---------------------------------------------------------------------------

class FullNetworkLinear:
    """Pallas-TPU forward of FullNetworkModel's single nn.Linear."""

    # Total f32 footprint (x, W^T, b, y) below this goes through the
    # single-block fast path.
    _SMALL_PATH_BYTES = 2 * 1024 * 1024

    def __init__(self, weight, bias):
        out_dim, in_dim = weight.shape
        assert bias.shape == (out_dim,)
        self.in_dim = in_dim
        self.out_dim = out_dim

        # --- one-time parameter prep (hoisted out of forward) --------------
        # nn.Linear stores W as (out, in); transpose once to (in, out) so the
        # kernel does a plain NN-form contraction.
        self.wt = jnp.asarray(weight, jnp.float32).T                 # (in, out)
        self.b2 = jnp.asarray(bias, jnp.float32).reshape(1, out_dim)

        # Tiled-path tile sizes depend only on parameter dims, so the padded
        # weight/bias are also built exactly once here.
        self.tk = min(512, _round_up(in_dim, 128))
        np128 = _round_up(out_dim, 128)
        # tn=128 keeps >=2 blocks on the (parallel) N axis for Np<=256 so both
        # v7x TensorCores engage even with a single M block; large multiples
        # of 256 use tn=256 for better MXU-tile efficiency on v6e/v7x.
        self.tn = 256 if (np128 >= 512 and np128 % 256 == 0) else 128

        self.Kp = _round_up(in_dim, self.tk)
        self.Np = _round_up(out_dim, self.tn)
        if (self.Kp, self.Np) == (in_dim, out_dim):
            self.wt_pad = self.wt
            self.b_pad = self.b2
        else:
            self.wt_pad = jnp.pad(
                self.wt, ((0, self.Kp - in_dim), (0, self.Np - out_dim)))
            self.b_pad = jnp.pad(self.b2, ((0, 0), (0, self.Np - out_dim)))

    # -- fast path: one VMEM-resident block, no padding, no K loop ----------
    def _small_forward(self, x):
        B = x.shape[0]
        flops = 2 * B * self.in_dim * self.out_dim
        bytes_accessed = 4 * (B * self.in_dim + self.in_dim * self.out_dim
                              + self.out_dim + B * self.out_dim)
        return pl.pallas_call(
            _small_linear_kernel,
            out_shape=jax.ShapeDtypeStruct((B, self.out_dim), jnp.float32),
            grid=(1,),
            in_specs=[
                pl.BlockSpec((B, self.in_dim), lambda i: (0, 0)),
                pl.BlockSpec((self.in_dim, self.out_dim), lambda i: (0, 0)),
                pl.BlockSpec((1, self.out_dim), lambda i: (0, 0)),
            ],
            out_specs=pl.BlockSpec((B, self.out_dim), lambda i: (0, 0)),
            cost_estimate=pl.CostEstimate(
                flops=flops, transcendentals=0, bytes_accessed=bytes_accessed),
        )(x, self.wt, self.b2)

    # -- tiled path: M/N/K grid, K-last reduction, accumulate into o_ref ----
    def _tiled_forward(self, x):
        B = x.shape[0]
        # Minimal-padding tm; the 256 cap is a multiple of 128 (v5e MXU rows).
        tm = min(_round_up(B, 8), 256)
        tn, tk, Kp, Np = self.tn, self.tk, self.Kp, self.Np
        Mp = _round_up(B, tm)

        pad_m, pad_k = Mp - B, Kp - self.in_dim
        xp = x if (pad_m == 0 and pad_k == 0) else jnp.pad(
            x, ((0, pad_m), (0, pad_k)))

        gi, gj, gk = Mp // tm, Np // tn, Kp // tk

        flops = 2 * Mp * Np * Kp
        # Count re-reads: x fetched once per N block, W once per M block.
        bytes_accessed = 4 * (Mp * Kp * gj + Kp * Np * gi + Mp * Np + Np * gi)
        # Live VMEM: double-buffered x/W/b input tiles + double-buffered output.
        live_vmem = 4 * (2 * (tm * tk + tk * tn + tn) + 2 * tm * tn)
        # 32 MiB clamp: safe on v7x (64 MiB physical), far below v5e/v6e
        # (128 MiB); at the default tile caps live_vmem ~2.6 MiB so it never
        # binds anyway.
        vmem_limit = min(max(4 * live_vmem, 8 * 1024 * 1024), 32 * 1024 * 1024)

        out = pl.pallas_call(
            _tiled_linear_kernel,
            out_shape=jax.ShapeDtypeStruct((Mp, Np), jnp.float32),
            grid_spec=pltpu.PrefetchScalarGridSpec(
                num_scalar_prefetch=0,
                grid=(gi, gj, gk),
                in_specs=[
                    pl.BlockSpec((tm, tk), lambda i, j, k: (i, k)),   # x
                    pl.BlockSpec((tk, tn), lambda i, j, k: (k, j)),   # W^T
                    pl.BlockSpec((1, tn), lambda i, j, k: (0, j)),    # bias
                ],
                out_specs=pl.BlockSpec((tm, tn), lambda i, j, k: (i, j)),
            ),
            compiler_params=pltpu.CompilerParams(
                dimension_semantics=("parallel", "parallel", "arbitrary"),
                vmem_limit_bytes=vmem_limit,
            ),
            cost_estimate=pl.CostEstimate(
                flops=flops, transcendentals=0, bytes_accessed=bytes_accessed),
        )(xp, self.wt_pad, self.b_pad)

        if Mp != B or Np != self.out_dim:
            out = out[:B, :self.out_dim]
        return out

    def __call__(self, x, *, force_tiled: bool = False):
        B, in_dim = x.shape
        assert in_dim == self.in_dim, "input feature dim mismatch"
        total_bytes = 4 * (B * in_dim + in_dim * self.out_dim
                           + self.out_dim + B * self.out_dim)
        if not force_tiled and total_bytes <= self._SMALL_PATH_BYTES:
            return self._small_forward(x)
        return self._tiled_forward(x)


if __name__ == "__main__":
    # Shapes consistent with FullNetworkModel(in_features=4, num_edges=8,
    # out_features=4) applied to a batch of 2.
    in_features, num_edges, out_features = 4, 8, 4
    batch = 2
    in_dim = in_features * num_edges      # 32
    out_dim = out_features * num_edges    # 32

    key = jax.random.PRNGKey(0)
    kx, kw, kb = jax.random.split(key, 3)

    x = jax.random.normal(kx, (batch, in_dim), dtype=jnp.float32)
    # Deterministic nn.Linear-style init: W (out, in), b (out,)
    bound = 1.0 / jnp.sqrt(jnp.float32(in_dim))
    weight = jax.random.uniform(kw, (out_dim, in_dim), dtype=jnp.float32,
                                minval=-bound, maxval=bound)
    bias = jax.random.uniform(kb, (out_dim,), dtype=jnp.float32,
                              minval=-bound, maxval=bound)

    model = FullNetworkLinear(weight, bias)

    # Fast (single-block, no-pad) path -- the one these shapes actually hit.
    y = model(x)
    jax.block_until_ready(y)

    y_ref = x @ weight.T + bias
    assert y.shape == (batch, out_dim)
    assert jnp.allclose(y, y_ref, atol=1e-5, rtol=1e-5)

    # Also exercise the tiled M/N/K path on the same problem to validate it.
    y_tiled = model(x, force_tiled=True)
    jax.block_until_ready(y_tiled)
    assert jnp.allclose(y_tiled, y_ref, atol=1e-5, rtol=1e-5)

    print("KERNEL_OK")
</pallas_src>

<mosaic_0001>
module attributes {stable_mosaic.version = 11 : i64} {
  func.func @_small_linear_kernel(%arg0: i32, %arg1: memref<2x32xf32, #tpu.memory_space<vmem>>, %arg2: memref<32x32xf32, #tpu.memory_space<vmem>>, %arg3: memref<1x32xf32, #tpu.memory_space<vmem>>, %arg4: memref<2x32xf32, #tpu.memory_space<vmem>>) attributes {dimension_semantics = [#tpu.dimension_semantics<arbitrary>], iteration_bounds = array<i64: 1>, scalar_prefetch = 0 : i64, scratch_operands = 0 : i64, tpu.core_type = #tpu.core_type<tc>, window_params = [{pipeline_mode = #tpu.pipeline_mode<synchronous>, transform_indices = @transform_0, window_bounds = array<i64: 2, 32>}, {pipeline_mode = #tpu.pipeline_mode<synchronous>, transform_indices = @transform_1, window_bounds = array<i64: 32, 32>}, {pipeline_mode = #tpu.pipeline_mode<synchronous>, transform_indices = @transform_2, window_bounds = array<i64: 1, 32>}, {pipeline_mode = #tpu.pipeline_mode<synchronous>, transform_indices = @transform_3, window_bounds = array<i64: 2, 32>}]} {
    %c0 = arith.constant 0 : index
    %c0_0 = arith.constant 0 : index
    %0 = vector.load %arg1[%c0, %c0_0] : memref<2x32xf32, #tpu.memory_space<vmem>>, vector<2x32xf32>
    %c0_1 = arith.constant 0 : index
    %c0_2 = arith.constant 0 : index
    %1 = vector.load %arg2[%c0_1, %c0_2] : memref<32x32xf32, #tpu.memory_space<vmem>>, vector<32x32xf32>
    %cst = arith.constant dense<0.000000e+00> : vector<2x32xf32>
    %2 = tpu.matmul %0, %1, %cst {dimension_numbers = #tpu.dot_dimension_numbers<[1], [0], [0], [1], [0, 0, 1, 1], [], []>} : vector<2x32xf32>, vector<32x32xf32>, vector<2x32xf32> -> vector<2x32xf32>
    %c0_3 = arith.constant 0 : index
    %c0_4 = arith.constant 0 : index
    %3 = vector.load %arg3[%c0_3, %c0_4] : memref<1x32xf32, #tpu.memory_space<vmem>>, vector<1x32xf32>
    %4 = vector.broadcast %3 : vector<1x32xf32> to vector<2x32xf32>
    %5 = arith.addf %2, %4 : vector<2x32xf32>
    %c0_5 = arith.constant 0 : index
    %c0_6 = arith.constant 0 : index
    %6 = vector.load %arg4[%c0_5, %c0_6] : memref<2x32xf32, #tpu.memory_space<vmem>>, vector<2x32xf32>
    tpu.vector_store %arg4[%c0_5, %c0_6], %5 {strides = array<i32>} : memref<2x32xf32, #tpu.memory_space<vmem>>, vector<2x32xf32>,
    return
  }
  func.func @transform_0(%arg0: i32) -> (i32, i32) {
    %c0_i32 = arith.constant 0 : i32
    %c0_i32_0 = arith.constant 0 : i32
    %c0_i32_1 = arith.constant 0 : i32
    return %c0_i32, %c0_i32_0 : i32, i32
  }
  func.func @transform_1(%arg0: i32) -> (i32, i32) {
    %c0_i32 = arith.constant 0 : i32
    %c0_i32_0 = arith.constant 0 : i32
    %c0_i32_1 = arith.constant 0 : i32
    return %c0_i32, %c0_i32_0 : i32, i32
  }
  func.func @transform_2(%arg0: i32) -> (i32, i32) {
    %c0_i32 = arith.constant 0 : i32
    %c0_i32_0 = arith.constant 0 : i32
    %c0_i32_1 = arith.constant 0 : i32
    return %c0_i32, %c0_i32_0 : i32, i32
  }
  func.func @transform_3(%arg0: i32) -> (i32, i32) {
    %c0_i32 = arith.constant 0 : i32
    %c0_i32_0 = arith.constant 0 : i32
    %c0_i32_1 = arith.constant 0 : i32
    return %c0_i32, %c0_i32_0 : i32, i32
  }
}

</mosaic_0001>

<bundles_post_ra>
// kernel: tpu_custom_call.1
= control target key start
LH: loop header
LB: loop body
LE: loop exit
PB: predicated region body
PF: predicated region fallthrough
CT: control target
= control target key end

     0   :  { %8 = vsyncpa [#allocation3], 0  ;;  %s323_s0 = inlined_call_operand.hbm [shape: f32[2,32], index: 0, kind: input, shape index: {}]   ;;  %s324_s1 = inlined_call_operand.hbm [shape: f32[32,32], index: 1, kind: input, shape index: {}]   ;;  %s325_s2 = inlined_call_operand.vmem [shape: f32[1,32], index: 2, kind: input, shape index: {}]   ;;  %s326_s3 = inlined_call_operand.hbm [shape: f32[2,32], index: 3, kind: output, shape index: {}]  }
   0x1   :  { %9 = vsyncpa [#allocation6], 0 }
   0x2   :  { %10 = vsyncpa [#allocation4], 0  ;;  %s249_s12 = smov [#allocation2]   ;;  %s250_s14 = smov [#allocation5]  }
   0x3   :  { %s17_s13 = sshll.u32 %s249_s12, 4  ;;  %s26_s15 = sshll.u32 %s250_s14, 4  ;;  %s18_s13 = int_to_ptr.vmem [resolvable:$true] %s17_s13  ;;  %s277_s15 = int_to_ptr.vmem [resolvable:$true] %s26_s15 }
   0x4   :  { %s177_s18 = scalar_lea.hbm %s323_s0, 32 }
   0x5   :  { %p178_p0 = scmp.ne.s32.totalorder %s323_s0, %s177_s18  ;;  %p181_p1 = scmp.lt.u32.totalorder %s177_s18, %s323_s0 }
   0x7   :  { %p183_p2 = pnand %p181_p1, %p178_p0 }
   0x9   :  { %186 = shalt.err (!%p183_p2)
}
   0xa   :  { %s187_s23 = scalar_lea.vmem %s18_s13, 32  ;;  %p192_p4 = scmp.lt.s32.totalorder %s18_s13, %s18_s13 }
   0xb   :  { %p188_p3 = scmp.ne.s32.totalorder %s18_s13, %s187_s23  ;;  %p193_p5 = scmp.lt.s32.totalorder %s187_s23, %s187_s23 }
   0xd   :  { %p194_p6 = por %p193_p5, %p192_p4 }
   0xf   :  { %p195_p7 = pnand %p194_p6, %p188_p3 }
  0x11   :  { %198 = shalt.err (!%p195_p7)
}
  0x12   :  { %20 = dma.hbm_to_vmem [thread:$0]  %s323_s0, 32, %s18_s13, [#allocation3]  }
  0x13   :  { %s199_s28 = scalar_lea.hbm %s324_s1, 512 }
  0x14   :  { %p200_p8 = scmp.ne.s32.totalorder %s324_s1, %s199_s28  ;;  %p203_p9 = scmp.lt.u32.totalorder %s199_s28, %s324_s1 }
  0x16   :  { %p205_p10 = pnand %p203_p9, %p200_p8 }
  0x18   :  { %208 = shalt.err (!%p205_p10)
}
  0x19   :  { %s209_s6 = scalar_lea.vmem %s277_s15, 512  ;;  %p214_p12 = scmp.lt.s32.totalorder %s277_s15, %s277_s15 }
  0x1a   :  { %p210_p11 = scmp.ne.s32.totalorder %s277_s15, %s209_s6  ;;  %p215_p13 = scmp.lt.s32.totalorder %s209_s6, %s209_s6 }
  0x1c   :  { %p216_p0 = por %p215_p13, %p214_p12 }
  0x1e   :  { %p217_p1 = pnand %p216_p0, %p210_p11 }
  0x20   :  { %220 = shalt.err (!%p217_p1)
}
  0x21   :  { %s251_s0 = smov 128   ;;  %s252_s7 = smov 8  }
  0x22   :  { %32 = dma.hbm_to_vmem [thread:$0]  %s324_s1, 512, %s277_s15, [#allocation6], %s251_s0, %s251_s0, %s252_s7  }
  0x23   :  { %243 = dma.done.wait [#allocation3], 32  }
  0x24   :  { %244 = vsyncadd [#allocation3], 4294967264 }
  0x25   :  { %245 = dma.done.wait [#allocation6], 512  }
  0x26   :  { %246 = vsyncadd [#allocation6], 4294966784  ;;  %v253_v0 = vmov 0.0|0.0   ;;  %vm254_vm0 = vmmov 0   ;;  %v255_v1 = vmov 0.0   ;;  %v42_v2 = vld [vmem:[#allocation5] sm:$0xff] }
  0x27   :  { %163 = vmatprep.subr.bf16.mxu0 %v253_v0  ;;  %160 = vmatprep.mubr.msk.f32.mxu0 %vm254_vm0, %v255_v1  ;;  %v43_v3 = vld [vmem:[#allocation5 + $0x8] sm:$0xff]  ;;  %v44_v4 = vld [vmem:[#allocation5 + $0x10] sm:$0xff]  ;;  %v45_v6 = vld [vmem:[#allocation5 + $0x18] sm:$0xff]  ;;  %vm53_vm1 = vcmask 261120   ;;  %s256_s11 = smov [#allocation7]   ;;  %vm127_vm2 = vcmask 254976  }
  0x28   :  { %v164_v5 = vpack.c.bf16 %v43_v3, %v42_v2  ;;  %v167_v7 = vpack.c.bf16 %v45_v6, %v44_v4  ;;  %v41_v8 = vld [vmem:[#allocation2] sm:$0x3]  ;;  %s135_s12 = sshll.u32 %s256_s11, 4  ;;  %s136_s12 = int_to_ptr.vmem [resolvable:$true] %s135_s12 }
  0x29   :  { %v145_v9 = vld [vmem:[%s325_s2] ss:$0 sm:$0xff]  ;;  %s221_s13 = scalar_lea.vmem %s136_s12, 32  ;;  %p226_p3 = scmp.lt.s32.totalorder %s136_s12, %s136_s12 }
  0x2a   :  { %165 = vmatpush3.bf16.msra.mxu0 %v164_v5  ;;  %p222_p2 = scmp.ne.s32.totalorder %s136_s12, %s221_s13  ;;  %p227_p4 = scmp.lt.s32.totalorder %s221_s13, %s221_s13 }
  0x2b   :  { %166 = vmatprep.subr.bf16.mxu0 %v253_v0 }
  0x2c   :  { %p228_p5 = por %p227_p4, %p226_p3 }
  0x2e   :  { %168 = vmatpush3.bf16.msra.mxu0 %v167_v7  ;;  %p229_p6 = pnand %p228_p5, %p222_p2 }
  0x31   :  { %161 = vmatmul.mubr.msk.f32.vlgmr.msra.gmra.mrb[0].mxu0 %vm53_vm1, %v41_v8 }
 0x104   :  { %v123_v10 = vpop.f32.mrb[0].mxu0 }
 0x105   :  { %v124_v11 = vadd.f32 %v145_v9, %v123_v10  ;;  %v162_v12 = vpop.f32.mrb[1].mxu0 }
 0x107   :  { %128 = vst.msk [vmem:[#allocation7] sm:$0x3] %vm127_vm2, %v124_v11 }
 0x108   :  { %232 = shalt.err (!%p229_p6)
}
 0x109   :  { %s233_s16 = scalar_lea.hbm %s326_s3, 32 }
 0x10a   :  { %p234_p7 = scmp.ne.s32.totalorder %s326_s3, %s233_s16  ;;  %p237_p8 = scmp.lt.u32.totalorder %s233_s16, %s326_s3 }
 0x10c   :  { %p239_p9 = pnand %p237_p8, %p234_p7 }
 0x10e   :  { %242 = shalt.err (!%p239_p9)
}
 0x10f   :  { %138 = dma.vmem_to_hbm [thread:$0]  %s136_s12, 32, %s326_s3, [#allocation4]  }
 0x110   :  { %247 = dma.done.wait [#allocation4], 32  }
 0x111   :  { %248 = vsyncadd [#allocation4], 4294967264 }
 0x112   :  { %142 = vsyncpa [#allocation3], 1 }
 0x113   :  { %143 = vsyncpa [#allocation6], 1 }
 0x114   :  { %144 = vsyncpa [#allocation4], 1 }

</bundles_post_ra>
